<compile_context>
chip_gen: v7x
topology: tpu7x:2x2x1
jax: 0.10.0
libtpu: 0.0.40
codegen_flags: <defaults>
</compile_context>

<pallas_src>
import functools

import jax
import jax.numpy as jnp
from jax import lax
from jax.experimental import pallas as pl
from jax.experimental.pallas import tpu as pltpu


def _liquid_kernel(x_ref, w_in_ref, b_comb_ref, w_liq_ref, w_out_ref,
                   b_out_ref, inv_tau_ref, decay_ref, out_ref, *, steps: int):
    w_liq = w_liq_ref[...]                                    # (H, H), resident

    # Step-invariant drive: x @ W_in^T + (b_in + b_liq), computed once per block.
    xb = jnp.dot(x_ref[...], w_in_ref[...],
                 preferred_element_type=jnp.float32) + b_comb_ref[...]   # (tb, H) f32

    # Hoist the (1,H)->(tb,H) broadcasts out of the unrolled loop
    # (JAX does not CSE broadcast_in_dim; would otherwise be re-emitted per step).
    inv_tau = jnp.broadcast_to(inv_tau_ref[...], xb.shape)    # 1/tau        (f32)
    decay = jnp.broadcast_to(decay_ref[...], xb.shape)        # 1 - 1/tau    (f32)

    def body(_, h):
        # h is kept in f32; only the MXU operand is cast to the weight dtype (bf16).
        pre = jnp.dot(h.astype(w_liq.dtype), w_liq,
                      preferred_element_type=jnp.float32) + xb
        # h + (-h + tanh(pre))/tau  ==  h*(1 - 1/tau) + tanh(pre)*(1/tau)
        return h * decay + jnp.tanh(pre) * inv_tau

    h = lax.fori_loop(0, steps, body, jnp.zeros(xb.shape, jnp.float32),
                      unroll=True)

    out_ref[...] = (jnp.dot(h.astype(w_out_ref.dtype), w_out_ref[...],
                            preferred_element_type=jnp.float32)
                    + b_out_ref[...])


def liquid_nn_forward(x, params, steps: int = 3,
                      compute_dtype=jnp.bfloat16, max_batch_block: int = 256):
    """x: (B, input_size) f32. params: dict of transposed weights / 2-D biases."""
    x = jnp.asarray(x, jnp.float32)
    B, I = x.shape
    H = params["w_liq_t"].shape[0]
    O = params["w_out_t"].shape[1]

    # ---- host-side precompute (exact, free per call) ------------------------
    inv_tau = (1.0 / params["tau"]).astype(jnp.float32)               # (1, H)
    decay = (1.0 - inv_tau).astype(jnp.float32)                       # (1, H)
    b_comb = (params["b_in"] + params["b_liq"]).astype(jnp.float32)   # (1, H)

    # ---- lane-dense output: pad O up to a multiple of 128 -------------------
    O_pad = ((O + 127) // 128) * 128
    w_out_t = jnp.pad(params["w_out_t"], ((0, 0), (0, O_pad - O)))
    b_out = jnp.pad(params["b_out"], ((0, 0), (0, O_pad - O))).astype(jnp.float32)

    # ---- MXU-native operand dtype (f32 accumulation happens in-kernel) ------
    w_in_t = params["w_in_t"].astype(compute_dtype)
    w_liq_t = params["w_liq_t"].astype(compute_dtype)
    w_out_t = w_out_t.astype(compute_dtype)
    x_c = x.astype(compute_dtype)

    # ---- batch tiling (weights stay VMEM-resident; batch axis is parallel) --
    tb = int(min(max_batch_block, B))
    n_blocks = pl.cdiv(B, tb)
    B_pad = n_blocks * tb
    if B_pad != B:
        x_c = jnp.pad(x_c, ((0, B_pad - B), (0, 0)))

    kernel = functools.partial(_liquid_kernel, steps=steps)

    out = pl.pallas_call(
        kernel,
        out_shape=jax.ShapeDtypeStruct((B_pad, O_pad), jnp.float32),
        grid=(n_blocks,),
        in_specs=[
            pl.BlockSpec((tb, I), lambda b: (b, 0)),      # x (tiled over batch)
            pl.BlockSpec((I, H), lambda b: (0, 0)),       # W_in^T
            pl.BlockSpec((1, H), lambda b: (0, 0)),       # b_in + b_liq
            pl.BlockSpec((H, H), lambda b: (0, 0)),       # W_liq^T
            pl.BlockSpec((H, O_pad), lambda b: (0, 0)),   # W_out^T (lane-padded)
            pl.BlockSpec((1, O_pad), lambda b: (0, 0)),   # b_out   (lane-padded)
            pl.BlockSpec((1, H), lambda b: (0, 0)),       # 1/tau
            pl.BlockSpec((1, H), lambda b: (0, 0)),       # 1 - 1/tau
        ],
        out_specs=pl.BlockSpec((tb, O_pad), lambda b: (b, 0)),
        compiler_params=pltpu.CompilerParams(
            dimension_semantics=("parallel",)),           # v7x: 2 TCs split the batch
    )(x_c, w_in_t, b_comb, w_liq_t, w_out_t, b_out, inv_tau, decay)

    return out[:B, :O]


def init_params(key, input_size, hidden_size, output_size):
    """Deterministic synthetic init mirroring nn.Linear / torch.rand shapes."""
    ks = jax.random.split(key, 7)

    def linear(kw, kb, fan_in, fan_out):
        bound = 1.0 / jnp.sqrt(fan_in)
        # PyTorch stores weight as (out, in); we keep the transposed (in, out).
        w_t = jax.random.uniform(kw, (fan_in, fan_out), jnp.float32, -bound, bound)
        b = jax.random.uniform(kb, (1, fan_out), jnp.float32, -bound, bound)
        return w_t, b

    w_in_t, b_in = linear(ks[0], ks[1], input_size, hidden_size)
    w_liq_t, b_liq = linear(ks[2], ks[3], hidden_size, hidden_size)
    w_out_t, b_out = linear(ks[4], ks[5], hidden_size, output_size)
    # tau = torch.rand(hidden_size) in [0,1); lower-bounded at 0.05 here so the
    # synthetic demo's 1/tau Euler update stays numerically sane.
    tau = jax.random.uniform(ks[6], (1, hidden_size), jnp.float32, 0.05, 1.0)

    return dict(w_in_t=w_in_t, b_in=b_in,
                w_liq_t=w_liq_t, b_liq=b_liq,
                w_out_t=w_out_t, b_out=b_out,
                tau=tau)


def liquid_nn_reference(x, params, steps: int = 3):
    """Pure-JAX f32 reference mirroring the PyTorch module's op order exactly."""
    h = jnp.zeros((x.shape[0], params["w_liq_t"].shape[0]), jnp.float32)
    for _ in range(steps):
        pre = (h @ params["w_liq_t"] + params["b_liq"]
               + (x @ params["w_in_t"] + params["b_in"]))
        h = h + (-h + jnp.tanh(pre)) / params["tau"]
    return h @ params["w_out_t"] + params["b_out"]


def _rel_err(a, b):
    return float(jnp.linalg.norm(a - b) / jnp.maximum(jnp.linalg.norm(b), 1e-12))


if __name__ == "__main__":
    input_size, hidden_size, output_size = 16, 32, 8
    batch = 2

    key = jax.random.PRNGKey(0)
    k_x, k_p = jax.random.split(key)
    x = jax.random.normal(k_x, (batch, input_size), jnp.float32)
    params = init_params(k_p, input_size, hidden_size, output_size)

    ref = liquid_nn_reference(x, params, steps=3)

    # Full-precision path: tight check against the PyTorch-order f32 reference.
    out_f32 = jax.block_until_ready(
        liquid_nn_forward(x, params, steps=3, compute_dtype=jnp.float32))
    assert out_f32.shape == (batch, output_size)
    assert _rel_err(out_f32, ref) < 3e-5, "f32 kernel mismatch vs reference"

    # Default bf16-operand path (MXU-native); f32 accumulation -> small relative error.
    out_bf16 = jax.block_until_ready(liquid_nn_forward(x, params, steps=3))
    assert out_bf16.shape == (batch, output_size)
    assert _rel_err(out_bf16, ref) < 5e-2, "bf16 kernel mismatch vs reference"

    print("KERNEL_OK")
</pallas_src>

<mosaic_0001>
module attributes {stable_mosaic.version = 11 : i64} {
  func.func @_liquid_kernel(%arg0: i32, %arg1: memref<2x16xf32, #tpu.memory_space<vmem>>, %arg2: memref<16x32xf32, #tpu.memory_space<vmem>>, %arg3: memref<1x32xf32, #tpu.memory_space<vmem>>, %arg4: memref<32x32xf32, #tpu.memory_space<vmem>>, %arg5: memref<32x128xf32, #tpu.memory_space<vmem>>, %arg6: memref<1x128xf32, #tpu.memory_space<vmem>>, %arg7: memref<1x32xf32, #tpu.memory_space<vmem>>, %arg8: memref<1x32xf32, #tpu.memory_space<vmem>>, %arg9: memref<2x128xf32, #tpu.memory_space<vmem>>) attributes {dimension_semantics = [#tpu.dimension_semantics<parallel>], iteration_bounds = array<i64: 1>, scalar_prefetch = 0 : i64, scratch_operands = 0 : i64, tpu.core_type = #tpu.core_type<tc>, window_params = [{transform_indices = @transform_0, window_bounds = array<i64: 2, 16>}, {pipeline_mode = #tpu.pipeline_mode<synchronous>, transform_indices = @transform_1, window_bounds = array<i64: 16, 32>}, {pipeline_mode = #tpu.pipeline_mode<synchronous>, transform_indices = @transform_2, window_bounds = array<i64: 1, 32>}, {pipeline_mode = #tpu.pipeline_mode<synchronous>, transform_indices = @transform_3, window_bounds = array<i64: 32, 32>}, {pipeline_mode = #tpu.pipeline_mode<synchronous>, transform_indices = @transform_4, window_bounds = array<i64: 32, 128>}, {pipeline_mode = #tpu.pipeline_mode<synchronous>, transform_indices = @transform_5, window_bounds = array<i64: 1, 128>}, {pipeline_mode = #tpu.pipeline_mode<synchronous>, transform_indices = @transform_6, window_bounds = array<i64: 1, 32>}, {pipeline_mode = #tpu.pipeline_mode<synchronous>, transform_indices = @transform_7, window_bounds = array<i64: 1, 32>}, {transform_indices = @transform_8, window_bounds = array<i64: 2, 128>}]} {
    %c0 = arith.constant 0 : index
    %c0_0 = arith.constant 0 : index
    %0 = vector.load %arg4[%c0, %c0_0] : memref<32x32xf32, #tpu.memory_space<vmem>>, vector<32x32xf32>
    %c0_1 = arith.constant 0 : index
    %c0_2 = arith.constant 0 : index
    %1 = vector.load %arg1[%c0_1, %c0_2] : memref<2x16xf32, #tpu.memory_space<vmem>>, vector<2x16xf32>
    %c0_3 = arith.constant 0 : index
    %c0_4 = arith.constant 0 : index
    %2 = vector.load %arg2[%c0_3, %c0_4] : memref<16x32xf32, #tpu.memory_space<vmem>>, vector<16x32xf32>
    %cst = arith.constant dense<0.000000e+00> : vector<2x32xf32>
    %3 = tpu.matmul %1, %2, %cst {dimension_numbers = #tpu.dot_dimension_numbers<[1], [0], [0], [1], [0, 0, 1, 1], [], []>} : vector<2x16xf32>, vector<16x32xf32>, vector<2x32xf32> -> vector<2x32xf32>
    %c0_5 = arith.constant 0 : index
    %c0_6 = arith.constant 0 : index
    %4 = vector.load %arg3[%c0_5, %c0_6] : memref<1x32xf32, #tpu.memory_space<vmem>>, vector<1x32xf32>
    %5 = vector.broadcast %4 : vector<1x32xf32> to vector<2x32xf32>
    %6 = arith.addf %3, %5 : vector<2x32xf32>
    %c0_7 = arith.constant 0 : index
    %c0_8 = arith.constant 0 : index
    %7 = vector.load %arg7[%c0_7, %c0_8] : memref<1x32xf32, #tpu.memory_space<vmem>>, vector<1x32xf32>
    %8 = vector.shape_cast %7 : vector<1x32xf32> to vector<1x32xf32>
    %9 = vector.broadcast %8 : vector<1x32xf32> to vector<2x32xf32>
    %c0_9 = arith.constant 0 : index
    %c0_10 = arith.constant 0 : index
    %10 = vector.load %arg8[%c0_9, %c0_10] : memref<1x32xf32, #tpu.memory_space<vmem>>, vector<1x32xf32>
    %11 = vector.shape_cast %10 : vector<1x32xf32> to vector<1x32xf32>
    %12 = vector.broadcast %11 : vector<1x32xf32> to vector<2x32xf32>
    %cst_11 = arith.constant 0.000000e+00 : f32
    %13 = vector.broadcast %cst_11 : f32 to vector<2x32xf32>
    %c0_i32 = arith.constant 0 : i32
    %cst_12 = arith.constant dense<0.000000e+00> : vector<2x32xf32>
    %14 = tpu.matmul %13, %0, %cst_12 {dimension_numbers = #tpu.dot_dimension_numbers<[1], [0], [0], [1], [0, 0, 1, 1], [], []>} : vector<2x32xf32>, vector<32x32xf32>, vector<2x32xf32> -> vector<2x32xf32>
    %15 = arith.addf %14, %6 : vector<2x32xf32>
    %16 = arith.mulf %13, %12 : vector<2x32xf32>
    %17 = math.tanh %15 : vector<2x32xf32>
    %18 = arith.mulf %17, %9 : vector<2x32xf32>
    %19 = arith.addf %16, %18 : vector<2x32xf32>
    %c1_i32 = arith.constant 1 : i32
    %cst_13 = arith.constant dense<0.000000e+00> : vector<2x32xf32>
    %20 = tpu.matmul %19, %0, %cst_13 {dimension_numbers = #tpu.dot_dimension_numbers<[1], [0], [0], [1], [0, 0, 1, 1], [], []>} : vector<2x32xf32>, vector<32x32xf32>, vector<2x32xf32> -> vector<2x32xf32>
    %21 = arith.addf %20, %6 : vector<2x32xf32>
    %22 = arith.mulf %19, %12 : vector<2x32xf32>
    %23 = math.tanh %21 : vector<2x32xf32>
    %24 = arith.mulf %23, %9 : vector<2x32xf32>
    %25 = arith.addf %22, %24 : vector<2x32xf32>
    %c2_i32 = arith.constant 2 : i32
    %cst_14 = arith.constant dense<0.000000e+00> : vector<2x32xf32>
    %26 = tpu.matmul %25, %0, %cst_14 {dimension_numbers = #tpu.dot_dimension_numbers<[1], [0], [0], [1], [0, 0, 1, 1], [], []>} : vector<2x32xf32>, vector<32x32xf32>, vector<2x32xf32> -> vector<2x32xf32>
    %27 = arith.addf %26, %6 : vector<2x32xf32>
    %28 = arith.mulf %25, %12 : vector<2x32xf32>
    %29 = math.tanh %27 : vector<2x32xf32>
    %30 = arith.mulf %29, %9 : vector<2x32xf32>
    %31 = arith.addf %28, %30 : vector<2x32xf32>
    %c0_15 = arith.constant 0 : index
    %c0_16 = arith.constant 0 : index
    %32 = vector.load %arg5[%c0_15, %c0_16] : memref<32x128xf32, #tpu.memory_space<vmem>>, vector<32x128xf32>
    %cst_17 = arith.constant dense<0.000000e+00> : vector<2x128xf32>
    %33 = tpu.matmul %31, %32, %cst_17 {dimension_numbers = #tpu.dot_dimension_numbers<[1], [0], [0], [1], [0, 0, 1, 1], [], []>} : vector<2x32xf32>, vector<32x128xf32>, vector<2x128xf32> -> vector<2x128xf32>
    %c0_18 = arith.constant 0 : index
    %c0_19 = arith.constant 0 : index
    %34 = vector.load %arg6[%c0_18, %c0_19] : memref<1x128xf32, #tpu.memory_space<vmem>>, vector<1x128xf32>
    %35 = vector.broadcast %34 : vector<1x128xf32> to vector<2x128xf32>
    %36 = arith.addf %33, %35 : vector<2x128xf32>
    %c0_20 = arith.constant 0 : index
    %c0_21 = arith.constant 0 : index
    %37 = vector.load %arg9[%c0_20, %c0_21] : memref<2x128xf32, #tpu.memory_space<vmem>>, vector<2x128xf32>
    tpu.vector_store %arg9[%c0_20, %c0_21], %36 {strides = array<i32>} : memref<2x128xf32, #tpu.memory_space<vmem>>, vector<2x128xf32>,
    return
  }
  func.func @transform_0(%arg0: i32) -> (i32, i32) {
    %c0_i32 = arith.constant 0 : i32
    %c0_i32_0 = arith.constant 0 : i32
    return %arg0, %c0_i32 : i32, i32
  }
  func.func @transform_1(%arg0: i32) -> (i32, i32) {
    %c0_i32 = arith.constant 0 : i32
    %c0_i32_0 = arith.constant 0 : i32
    %c0_i32_1 = arith.constant 0 : i32
    return %c0_i32, %c0_i32_0 : i32, i32
  }
  func.func @transform_2(%arg0: i32) -> (i32, i32) {
    %c0_i32 = arith.constant 0 : i32
    %c0_i32_0 = arith.constant 0 : i32
    %c0_i32_1 = arith.constant 0 : i32
    return %c0_i32, %c0_i32_0 : i32, i32
  }
  func.func @transform_3(%arg0: i32) -> (i32, i32) {
    %c0_i32 = arith.constant 0 : i32
    %c0_i32_0 = arith.constant 0 : i32
    %c0_i32_1 = arith.constant 0 : i32
    return %c0_i32, %c0_i32_0 : i32, i32
  }
  func.func @transform_4(%arg0: i32) -> (i32, i32) {
    %c0_i32 = arith.constant 0 : i32
    %c0_i32_0 = arith.constant 0 : i32
    %c0_i32_1 = arith.constant 0 : i32
    return %c0_i32, %c0_i32_0 : i32, i32
  }
  func.func @transform_5(%arg0: i32) -> (i32, i32) {
    %c0_i32 = arith.constant 0 : i32
    %c0_i32_0 = arith.constant 0 : i32
    %c0_i32_1 = arith.constant 0 : i32
    return %c0_i32, %c0_i32_0 : i32, i32
  }
  func.func @transform_6(%arg0: i32) -> (i32, i32) {
    %c0_i32 = arith.constant 0 : i32
    %c0_i32_0 = arith.constant 0 : i32
    %c0_i32_1 = arith.constant 0 : i32
    return %c0_i32, %c0_i32_0 : i32, i32
  }
  func.func @transform_7(%arg0: i32) -> (i32, i32) {
    %c0_i32 = arith.constant 0 : i32
    %c0_i32_0 = arith.constant 0 : i32
    %c0_i32_1 = arith.constant 0 : i32
    return %c0_i32, %c0_i32_0 : i32, i32
  }
  func.func @transform_8(%arg0: i32) -> (i32, i32) {
    %c0_i32 = arith.constant 0 : i32
    %c0_i32_0 = arith.constant 0 : i32
    return %arg0, %c0_i32 : i32, i32
  }
}

</mosaic_0001>

<bundles_post_ra>
// kernel: tpu_custom_call.1
= control target key start
LH: loop header
LB: loop body
LE: loop exit
PB: predicated region body
PF: predicated region fallthrough
CT: control target
= control target key end

     0   :  { %13 = vsyncpa [#allocation3], 0  ;;  %s915_s0 = inlined_call_operand.hbm [shape: f32[2,16], index: 0, kind: input, shape index: {}]   ;;  %s916_s1 = inlined_call_operand.hbm [shape: f32[16,32], index: 1, kind: input, shape index: {}]   ;;  %s917_s2 = inlined_call_operand.vmem [shape: f32[1,32], index: 2, kind: input, shape index: {}]   ;;  %s918_s3 = inlined_call_operand.hbm [shape: f32[32,32], index: 3, kind: input, shape index: {}]   ;;  %s919_s4 = inlined_call_operand.hbm [shape: f32[32,128], index: 4, kind: input, shape index: {}]   ;;  %s920_s5 = inlined_call_operand.vmem [shape: f32[1,128], index: 5, kind: input, shape index: {}]   ;;  %s921_s6 = inlined_call_operand.vmem [shape: f32[1,32], index: 6, kind: input, shape index: {}]   ;;  %s922_s7 = inlined_call_operand.vmem [shape: f32[1,32], index: 7, kind: input, shape index: {}]   ;;  %s923_s8 = inlined_call_operand.hbm [shape: f32[2,128], index: 8, kind: output, shape index: {}]  }
   0x1   :  { %14 = vsyncpa [#allocation6], 0 }
   0x2   :  { %15 = vsyncpa [#allocation9], 0 }
   0x3   :  { %16 = vsyncpa [#allocation4], 0  ;;  %s762_s27 = smov [#allocation5]   ;;  %s644_s9 = scalar_lea.hbm %s916_s1, 256 }
   0x4   :  { %s32_s28 = sshll.u32 %s762_s27, 4  ;;  %p645_p0 = scmp.ne.s32.totalorder %s916_s1, %s644_s9  ;;  %s33_s28 = int_to_ptr.vmem [resolvable:$true] %s32_s28 }
   0x5   :  { %p648_p1 = scmp.lt.u32.totalorder %s644_s9, %s916_s1 }
   0x7   :  { %p650_p2 = pnand %p648_p1, %p645_p0 }
   0x9   :  { %653 = shalt.err (!%p650_p2)
}
   0xa   :  { %s654_s14 = scalar_lea.vmem %s33_s28, 256  ;;  %p659_p4 = scmp.lt.s32.totalorder %s33_s28, %s33_s28 }
   0xb   :  { %p655_p3 = scmp.ne.s32.totalorder %s33_s28, %s654_s14  ;;  %p660_p5 = scmp.lt.s32.totalorder %s654_s14, %s654_s14 }
   0xd   :  { %p661_p6 = por %p660_p5, %p659_p4 }
   0xf   :  { %p662_p7 = pnand %p661_p6, %p655_p3 }
  0x11   :  { %665 = shalt.err (!%p662_p7)
}
  0x12   :  { %s763_s15 = smov 128   ;;  %s764_s16 = smov 8  }
  0x13   :  { %38 = dma.hbm_to_vmem [thread:$0]  %s916_s1, 256, %s33_s28, [#allocation6], %s763_s15, %s763_s15, %s764_s16  }
  0x14   :  { %s765_s19 = smov [#allocation2]   ;;  %s766_s21 = smov [#allocation7]  }
  0x15   :  { %s23_s20 = sshll.u32 %s765_s19, 4  ;;  %s46_s22 = sshll.u32 %s766_s21, 4  ;;  %s24_s20 = int_to_ptr.vmem [resolvable:$true] %s23_s20  ;;  %s47_s22 = int_to_ptr.vmem [resolvable:$true] %s46_s22 }
  0x16   :  { %s666_s25 = scalar_lea.hbm %s915_s0, 32 }
  0x17   :  { %p667_p8 = scmp.ne.s32.totalorder %s915_s0, %s666_s25  ;;  %p670_p9 = scmp.lt.u32.totalorder %s666_s25, %s915_s0 }
  0x19   :  { %p672_p10 = pnand %p670_p9, %p667_p8 }
  0x1b   :  { %675 = shalt.err (!%p672_p10)
}
  0x1c   :  { %s676_s1 = scalar_lea.vmem %s24_s20, 32  ;;  %p681_p12 = scmp.lt.s32.totalorder %s24_s20, %s24_s20 }
  0x1d   :  { %p677_p11 = scmp.ne.s32.totalorder %s24_s20, %s676_s1  ;;  %p682_p13 = scmp.lt.s32.totalorder %s676_s1, %s676_s1 }
  0x1f   :  { %p683_p0 = por %p682_p13, %p681_p12 }
  0x21   :  { %p684_p1 = pnand %p683_p0, %p677_p11 }
  0x23   :  { %687 = shalt.err (!%p684_p1)
}
  0x24   :  { %26 = dma.hbm_to_vmem [thread:$0]  %s915_s0, 32, %s24_s20, [#allocation3]  }
  0x25   :  { %s688_s12 = scalar_lea.hbm %s918_s3, 512 }
  0x26   :  { %p689_p2 = scmp.ne.s32.totalorder %s918_s3, %s688_s12  ;;  %p692_p3 = scmp.lt.u32.totalorder %s688_s12, %s918_s3 }
  0x28   :  { %p694_p4 = pnand %p692_p3, %p689_p2 }
  0x2a   :  { %697 = shalt.err (!%p694_p4)
}
  0x2b   :  { %s698_s19 = scalar_lea.vmem %s47_s22, 512  ;;  %p703_p6 = scmp.lt.s32.totalorder %s47_s22, %s47_s22 }
  0x2c   :  { %p699_p5 = scmp.ne.s32.totalorder %s47_s22, %s698_s19  ;;  %p704_p7 = scmp.lt.s32.totalorder %s698_s19, %s698_s19 }
  0x2e   :  { %p705_p8 = por %p704_p7, %p703_p6 }
  0x30   :  { %p706_p9 = pnand %p705_p8, %p699_p5 }
  0x32   :  { %709 = shalt.err (!%p706_p9)
}
  0x33   :  { %52 = dma.hbm_to_vmem [thread:$0]  %s918_s3, 512, %s47_s22, [#allocation6], %s763_s15, %s763_s15, %s764_s16  }
  0x34   :  { %s767_s21 = smov [#allocation8]   ;;  %s710_s26 = scalar_lea.hbm %s919_s4, 512 }
  0x35   :  { %s58_s23 = sshll.u32 %s767_s21, 4  ;;  %p711_p10 = scmp.ne.s32.totalorder %s919_s4, %s710_s26  ;;  %s59_s23 = int_to_ptr.vmem [resolvable:$true] %s58_s23 }
  0x36   :  { %p714_p11 = scmp.lt.u32.totalorder %s710_s26, %s919_s4 }
  0x38   :  { %p716_p12 = pnand %p714_p11, %p711_p10 }
  0x3a   :  { %719 = shalt.err (!%p716_p12)
}
  0x3b   :  { %s720_s28 = scalar_lea.vmem %s59_s23, 512  ;;  %p725_p0 = scmp.lt.s32.totalorder %s59_s23, %s59_s23 }
  0x3c   :  { %p721_p13 = scmp.ne.s32.totalorder %s59_s23, %s720_s28  ;;  %p726_p1 = scmp.lt.s32.totalorder %s720_s28, %s720_s28 }
  0x3e   :  { %p727_p2 = por %p726_p1, %p725_p0 }
  0x40   :  { %p728_p3 = pnand %p727_p2, %p721_p13 }
  0x42   :  { %731 = shalt.err (!%p728_p3)
}
  0x43   :  { %64 = dma.hbm_to_vmem [thread:$0]  %s919_s4, 512, %s59_s23, [#allocation9], %s763_s15, %s763_s15, %s764_s16  }
  0x44   :  { %754 = dma.done.wait [#allocation3], 32  }
  0x45   :  { %755 = vsyncadd [#allocation3], 4294967264 }
  0x46   :  { %756 = dma.done.wait [#allocation6], 768  }
  0x47   :  { %757 = vsyncadd [#allocation6], 4294966528 }
  0x48   :  { %758 = dma.done.wait [#allocation9], 512  }
  0x49   :  { %759 = vsyncadd [#allocation9], 4294966784  ;;  %v768_v0 = vmov 0.0|0.0   ;;  %vm769_vm0 = vmmov 0   ;;  %v770_v1 = vmov 0.0   ;;  %v83_v2 = vld [vmem:[#allocation7] sm:$0xff] }
  0x4a   :  { %604 = vmatprep.subr.bf16.mxu1 %v768_v0  ;;  %601 = vmatprep.subr.bf16.mxu0 %v768_v0  ;;  %v84_v3 = vld [vmem:[#allocation7 + $0x8] sm:$0xff]  ;;  %v88_v4 = vld [vmem:[#allocation5] sm:$0xff]  ;;  %v89_v6 = vld [vmem:[#allocation5 + $0x8] sm:$0xff]  ;;  %vm97_vm1 = vcmask 130048   ;;  %vm185_vm2 = vcmask 261120  }
  0x4b   :  { %554 = vmatprep.mubr.msk.f32.mxu0 %vm769_vm0, %v770_v1  ;;  %565 = vmatprep.mubr.msk.f32.mxu1 %vm769_vm0, %v770_v1  ;;  %v605_v5 = vpack.c.bf16 %v84_v3, %v83_v2  ;;  %v85_v7 = vld [vmem:[#allocation7 + $0x10] sm:$0xff]  ;;  %v602_v8 = vpack.c.bf16 %v89_v6, %v88_v4  ;;  %v86_v9 = vld [vmem:[#allocation7 + $0x18] sm:$0xff]  ;;  %v87_v11 = vld [vmem:[#allocation2] sm:$0x3] }
  0x4c   :  { %v608_v10 = vpack.c.bf16 %v86_v9, %v85_v7  ;;  %v519_v12 = vld [vmem:[%s917_s2] ss:$0 sm:$0xff]  ;;  %v417_v32 = vld [vmem:[#allocation8] sm:$0xff]  ;;  %v419_v35 = vld [vmem:[#allocation8 + $0x10] sm:$0xff] }
  0x4d   :  { %606 = vmatpush3.bf16.msra.mxu1 %v605_v5  ;;  %603 = vmatpush3.bf16.msra.mxu0 %v602_v8  ;;  %v522_v19 = vld [vmem:[%s922_s7] ss:$0 sm:$0xff]  ;;  %v420_v36 = vld [vmem:[#allocation8 + $0x18] sm:$0xff]  ;;  %s771_s7 = smov [#allocation10]  }
  0x4e   :  { %607 = vmatprep.subr.bf16.mxu1 %v768_v0  ;;  %610 = vmatprep.subr.bf16.mxu0 %v768_v0  ;;  %v521_v20 = vld [vmem:[%s921_s6] ss:$0 sm:$0xff]  ;;  %v259_v21 = vmul.f32 0.0, %v522_v19  ;;  %v626_v37 = vpack.c.bf16 %v420_v36, %v419_v35  ;;  %s508_s12 = sshll.u32 %s771_s7, 4  ;;  %s509_s12 = int_to_ptr.vmem [resolvable:$true] %s508_s12 }
  0x4f   :  { %v418_v33 = vld [vmem:[#allocation8 + $0x8] sm:$0xff]  ;;  %s732_s13 = scalar_lea.vmem %s509_s12, 32  ;;  %p737_p5 = scmp.lt.s32.totalorder %s509_s12, %s509_s12 }
  0x50   :  { %555 = vmatmul.mubr.msk.f32.vlgmr.msra.gmra.mrb[0].mxu0 %vm97_vm1, %v87_v11  ;;  %v623_v34 = vpack.c.bf16 %v418_v33, %v417_v32  ;;  %v525_v45 = vld [vmem:[%s920_s5] ss:$0 sm:$0xff]  ;;  %p733_p4 = scmp.ne.s32.totalorder %s509_s12, %s732_s13  ;;  %p738_p6 = scmp.lt.s32.totalorder %s732_s13, %s732_s13 }
  0x51   :  { %609 = vmatpush3.bf16.msra.mxu1 %v608_v10  ;;  %612 = vmatpush3.bf16.msra.mxu0 %v605_v5 }
  0x52   :  { %576 = vmatprep.mubr.msk.f32.mxu0 %vm769_vm0, %v770_v1  ;;  %613 = vmatprep.subr.bf16.mxu0 %v768_v0  ;;  %p739_p7 = por %p738_p6, %p737_p5 }
  0x53   :  { %616 = vmatprep.subr.bf16.mxu1 %v768_v0 }
  0x54   :  { %566 = vmatmul.mubr.f32.vlgmr.msra.gmra.mrb[0].mxu1 %v770_v1  ;;  %p740_p8 = pnand %p739_p7, %p733_p4 }
  0x55   :  { %618 = vmatpush3.bf16.msra.mxu1 %v605_v5  ;;  %587 = vmatprep.mubr.msk.f32.mxu1 %vm769_vm0, %v770_v1 }
  0x56   :  { %615 = vmatpush3.bf16.msra.mxu0 %v608_v10  ;;  %619 = vmatprep.subr.bf16.mxu1 %v768_v0 }
  0x57   :  { %622 = vmatprep.subr.bf16.mxu0 %v768_v0 }
  0x59   :  { %621 = vmatpush3.bf16.msra.mxu1 %v608_v10 }
 0x123   :  { %v167_v13 = vpop.f32.mrb[0].mxu0 }
 0x124   :  { %v168_v14 = vadd.f32 %v519_v12, %v167_v13  ;;  %v556_v15 = vpop.f32.mrb[1].mxu0 }
 0x127   :  { %v255_v16 = vpop.f32.mrb[0].mxu1 }
 0x128   :  { %v256_v17 = vadd.f32 %v255_v16, %v168_v14  ;;  %v567_v18 = vpop.f32.mrb[1].mxu1 }
 0x12a   :  { %638 = vtanh.f32 %v256_v17 }
 0x134   :  { %v639_v22 = vpop.eup %638 }
 0x135   :  { %v261_v23 = vmul.f32 %v639_v22, %v521_v20 }
 0x137   :  { %v262_v24 = vadd.f32 %v261_v23, %v259_v21 }
 0x139   :  { %577 = vmatmul.mubr.msk.f32.vlgmr.msra.gmra.mrb[2].mxu0 %vm185_vm2, %v262_v24  ;;  %v336_v30 = vmul.f32 %v522_v19, %v262_v24 }
 0x13a   :  { %598 = vmatprep.mubr.msk.f32.mxu0 %vm769_vm0, %v770_v1  ;;  %624 = vmatpush3.bf16.msra.mxu0 %v623_v34 }
 0x13b   :  { %625 = vmatprep.subr.bf16.mxu0 %v768_v0 }
 0x13e   :  { %627 = vmatpush3.bf16.msra.mxu0 %v626_v37 }
 0x20c   :  { %v332_v25 = vpop.f32.mrb[2].mxu0 }
 0x20d   :  { %v333_v26 = vadd.f32 %v332_v25, %v168_v14  ;;  %v578_v27 = vpop.f32.mrb[3].mxu0 }
 0x20f   :  { %640 = vtanh.f32 %v333_v26 }
 0x219   :  { %v641_v28 = vpop.eup %640 }
 0x21a   :  { %v338_v29 = vmul.f32 %v641_v28, %v521_v20 }
 0x21c   :  { %v339_v31 = vadd.f32 %v338_v29, %v336_v30 }
 0x21e   :  { %588 = vmatmul.mubr.msk.f32.vlgmr.msra.gmra.mrb[2].mxu1 %vm185_vm2, %v339_v31  ;;  %v413_v43 = vmul.f32 %v522_v19, %v339_v31 }
 0x2f1   :  { %v409_v38 = vpop.f32.mrb[2].mxu1 }
 0x2f2   :  { %v410_v39 = vadd.f32 %v409_v38, %v168_v14  ;;  %v589_v40 = vpop.f32.mrb[3].mxu1 }
 0x2f4   :  { %642 = vtanh.f32 %v410_v39 }
 0x2fe   :  { %v643_v41 = vpop.eup %642 }
 0x2ff   :  { %v415_v42 = vmul.f32 %v643_v41, %v521_v20 }
 0x301   :  { %v416_v44 = vadd.f32 %v415_v42, %v413_v43 }
 0x303   :  { %599 = vmatmul.mubr.msk.f32.vlgmr.msra.gmra.mrb[4].mxu0 %vm185_vm2, %v416_v44 }
 0x3d6   :  { %v497_v46 = vpop.f32.mrb[4].mxu0 }
 0x3d7   :  { %v498_v47 = vadd.f32 %v525_v45, %v497_v46  ;;  %v600_v48 = vpop.f32.mrb[5].mxu0 }
 0x3d9   :  { %501 = vst [vmem:[#allocation10] sm:$0x3] %v498_v47 }
 0x3da   :  { %743 = shalt.err (!%p740_p8)
}
 0x3db   :  { %s744_s18 = scalar_lea.hbm %s923_s8, 32 }
 0x3dc   :  { %p745_p9 = scmp.ne.s32.totalorder %s923_s8, %s744_s18  ;;  %p748_p10 = scmp.lt.u32.totalorder %s744_s18, %s923_s8 }
 0x3de   :  { %p750_p11 = pnand %p748_p10, %p745_p9 }
 0x3e0   :  { %753 = shalt.err (!%p750_p11)
}
 0x3e1   :  { %511 = dma.vmem_to_hbm [thread:$0]  %s509_s12, 32, %s923_s8, [#allocation4]  }
 0x3e2   :  { %760 = dma.done.wait [#allocation4], 32  }
 0x3e3   :  { %761 = vsyncadd [#allocation4], 4294967264 }
 0x3e4   :  { %515 = vsyncpa [#allocation3], 1 }
 0x3e5   :  { %516 = vsyncpa [#allocation6], 1 }
 0x3e6   :  { %517 = vsyncpa [#allocation9], 1 }
 0x3e7   :  { %518 = vsyncpa [#allocation4], 1 }

</bundles_post_ra>
